<compile_context>
chip_gen: v6e
topology: v6e:2x2x1
jax: 0.10.0
libtpu: 0.0.40
codegen_flags: <defaults>
</compile_context>

<pallas_src>
import functools

import numpy as np
import jax
import jax.numpy as jnp
from jax.experimental import pallas as pl
from jax.experimental.pallas import tpu as pltpu

NUM_PARTICLES = 8
LATENT = 16
HIDDEN = (32, 32)
HEAD_KINE = NUM_PARTICLES * 4      # 32 lanes
HEAD_CLASS = NUM_PARTICLES * 9     # 72 lanes
HEAD_PAD = 128                     # fused, lane-dense head width

BATCH = 200                        # demo batch (exercises padding + 2-step grid)
MAX_TILE = 1024                    # rows per grid step at large B (512-2048 optimal)


def _round_up(n, m):
    return (n + m - 1) // m * m


# --------------------------------------------------------------------------
# Kernel
# --------------------------------------------------------------------------
def decoder_kernel(x_ref, w0_ref, b0_ref, w1_ref, b1_ref,
                   wh_ref, bh_ref, g_ref, mask_ref, out_ref):
    # stack_layers == Linear(16,32) -> ReLU -> Linear(32,32) -> ReLU
    h = x_ref[...]
    h = jnp.dot(h, w0_ref[...], preferred_element_type=jnp.float32) + b0_ref[...]
    h = jnp.maximum(h, 0.0)
    h = jnp.dot(h, w1_ref[...], preferred_element_type=jnp.float32) + b1_ref[...]
    h = jnp.maximum(h, 0.0)

    # Fused heads: lanes [0:32)=kine, [32:104)=class logits, [104:128)=zero pad.
    logits = jnp.dot(h, wh_ref[...], preferred_element_type=jnp.float32) + bh_ref[...]

    maskc = mask_ref[...]                      # (1, 128) float: 1.0 on class lanes
    is_cls = maskc > 0.5

    # Row max over class lanes for numerical stability.
    # NOTE: global over the 8 particles (not per-particle).  Identical to
    # jax.nn.log_softmax for ordinary logit ranges; only diverges if a
    # particle's logits sit >~88 below the row's global class max.
    m = jnp.max(jnp.where(is_cls, logits, jnp.float32(-1e30)),
                axis=-1, keepdims=True)                        # (TB, 1)
    # e MUST stay exactly zero on non-class lanes: the (1 - maskc) term below
    # relies on it to keep log() finite on kine/pad lanes.
    e = jnp.where(is_cls, jnp.exp(logits - m), 0.0)            # (TB, 128)

    # Per-particle sum of exp via one block-diagonal matmul; +1 on non-class
    # lanes keeps log() finite there (those lanes are masked out below anyway).
    denom = jnp.dot(e, g_ref[...], preferred_element_type=jnp.float32) + (1.0 - maskc)

    # Class lanes: log-softmax; kine/pad lanes: pass-through.
    out_ref[...] = logits - maskc * (m + jnp.log(denom))


# --------------------------------------------------------------------------
# One-time (host-side) parameter preparation -- off the per-call launch path.
# --------------------------------------------------------------------------
def prepare_decoder_params(params):
    """Fuse the two head Linears into one zero-padded (32,128) weight and build
    the softmax-group constants.  Called once; keeps pad/scatter ops out of the
    jit'd forward (pure launch overhead on a few-microsecond kernel)."""
    w0, b0, w1, b1, wk, bk, wc, bc = params

    wh = np.zeros((HIDDEN[-1], HEAD_PAD), np.float32)
    wh[:, :HEAD_KINE] = np.asarray(wk)
    wh[:, HEAD_KINE:HEAD_KINE + HEAD_CLASS] = np.asarray(wc)
    bh = np.zeros((1, HEAD_PAD), np.float32)
    bh[:, :HEAD_KINE] = np.asarray(bk).reshape(1, -1)
    bh[:, HEAD_KINE:HEAD_KINE + HEAD_CLASS] = np.asarray(bc).reshape(1, -1)

    lane = np.arange(HEAD_PAD)
    is_cls = (lane >= HEAD_KINE) & (lane < HEAD_KINE + HEAD_CLASS)
    cls_mask = is_cls.astype(np.float32)[None, :]                     # (1, 128)
    grp = np.where(is_cls, (lane - HEAD_KINE) // 9, -1)
    g_block = ((grp[:, None] == grp[None, :])
               & is_cls[:, None] & is_cls[None, :]).astype(np.float32)  # (128, 128)

    return (jnp.asarray(w0), jnp.asarray(b0), jnp.asarray(w1), jnp.asarray(b1),
            jnp.asarray(wh), jnp.asarray(bh),
            jnp.asarray(g_block), jnp.asarray(cls_mask))


# --------------------------------------------------------------------------
# Tiling policy
# --------------------------------------------------------------------------
def _pick_tile(batch, max_tile=MAX_TILE):
    """Batch tile (rows per grid step, multiple of 8 sublanes).

    Fewest possible grid steps (each costs ~0.35 us of fixed overhead), but
    keep >= 2 steps when the batch allows so the "parallel" grid axis can be
    sharded across both v7x TensorCores.  Large batches tile at max_tile
    (512-2048 is the measured HBM-roofline sweet spot)."""
    bp8 = _round_up(batch, 8)
    if bp8 <= 8:
        return 8
    return min(max_tile, _round_up(pl.cdiv(bp8, 2), 8))


# --------------------------------------------------------------------------
# Forward wrapper
# --------------------------------------------------------------------------
@functools.partial(jax.jit, static_argnames=("max_tile",))
def decoder_forward(x, fused_params, *, max_tile=MAX_TILE):
    B = x.shape[0]
    w0, b0, w1, b1, wh, bh, g_block, cls_mask = fused_params

    tb = _pick_tile(B, max_tile)
    bp = _round_up(B, tb)
    # Minimal pad: the tile chooser makes tb divide round_up(B, 8) for small
    # B, so at most the 8-row sublane rounding (+ tail tile at large B) is
    # copied here.
    xp = x if bp == B else jnp.pad(x, ((0, bp - B), (0, 0)))

    def resident(shape):
        # Constant block index => stays VMEM-resident, not re-DMA'd per step.
        n = len(shape)
        return pl.BlockSpec(shape, lambda i, _n=n: (0,) * _n)

    out = pl.pallas_call(
        decoder_kernel,
        out_shape=jax.ShapeDtypeStruct((bp, HEAD_PAD), jnp.float32),
        grid=(bp // tb,),
        in_specs=[
            pl.BlockSpec((tb, LATENT), lambda i: (i, 0)),   # batch-tiled input
            resident(w0.shape), resident(b0.shape),
            resident(w1.shape), resident(b1.shape),
            resident(wh.shape), resident(bh.shape),
            resident(g_block.shape), resident(cls_mask.shape),
        ],
        out_specs=pl.BlockSpec((tb, HEAD_PAD), lambda i: (i, 0)),
        compiler_params=pltpu.CompilerParams(
            dimension_semantics=("parallel",)),             # megacore on v7x
    )(xp, w0, b0, w1, b1, wh, bh, g_block, cls_mask)

    # Match the PyTorch forward's two outputs.  (If the consumer can take the
    # raw (B,128) slab, skipping these slices saves one extra HBM pass.)
    out = out[:B]
    kine_pred = out[:, :HEAD_KINE].reshape(-1, NUM_PARTICLES, 4)
    class_pred = out[:, HEAD_KINE:HEAD_KINE + HEAD_CLASS].reshape(-1, NUM_PARTICLES, 9)
    return kine_pred, class_pred


# --------------------------------------------------------------------------
# Pure-JAX reference + deterministic init
# --------------------------------------------------------------------------
def reference_forward(x, params):
    w0, b0, w1, b1, wk, bk, wc, bc = params
    h = jnp.maximum(x @ w0 + b0, 0.0)
    h = jnp.maximum(h @ w1 + b1, 0.0)
    kine = (h @ wk + bk).reshape(-1, NUM_PARTICLES, 4)
    cls = jax.nn.log_softmax((h @ wc + bc).reshape(-1, NUM_PARTICLES, 9), axis=2)
    return kine, cls


def init_params(key):
    """PyTorch-style Linear init: U(-1/sqrt(fan_in), 1/sqrt(fan_in))."""
    def linear(k, fan_in, fan_out):
        k1, k2 = jax.random.split(k)
        bound = 1.0 / float(fan_in) ** 0.5
        w = jax.random.uniform(k1, (fan_in, fan_out), jnp.float32, -bound, bound)
        b = jax.random.uniform(k2, (1, fan_out), jnp.float32, -bound, bound)
        return w, b

    k0, k1, k2, k3 = jax.random.split(key, 4)
    w0, b0 = linear(k0, LATENT, HIDDEN[0])
    w1, b1 = linear(k1, HIDDEN[0], HIDDEN[1])
    wk, bk = linear(k2, HIDDEN[-1], NUM_PARTICLES * 4)
    wc, bc = linear(k3, HIDDEN[-1], NUM_PARTICLES * 9)
    return (w0, b0, w1, b1, wk, bk, wc, bc)


if __name__ == "__main__":
    key = jax.random.PRNGKey(0)
    k_param, k_x = jax.random.split(key)
    params = init_params(k_param)
    fused_params = prepare_decoder_params(params)      # one-time, off hot path
    x = jax.random.normal(k_x, (BATCH, LATENT), jnp.float32)

    kine_pred, class_pred = decoder_forward(x, fused_params)
    jax.block_until_ready((kine_pred, class_pred))

    kine_ref, class_ref = reference_forward(x, params)
    assert kine_pred.shape == (BATCH, NUM_PARTICLES, 4)
    assert class_pred.shape == (BATCH, NUM_PARTICLES, 9)
    assert jnp.allclose(kine_pred, kine_ref, atol=1e-5, rtol=1e-5)
    assert jnp.allclose(class_pred, class_ref, atol=1e-5, rtol=1e-5)

    print("KERNEL_OK")
</pallas_src>

<mosaic_0001>
module attributes {stable_mosaic.version = 11 : i64} {
  func.func @decoder_kernel(%arg0: i32, %arg1: memref<104x16xf32, #tpu.memory_space<vmem>>, %arg2: memref<16x32xf32, #tpu.memory_space<vmem>>, %arg3: memref<1x32xf32, #tpu.memory_space<vmem>>, %arg4: memref<32x32xf32, #tpu.memory_space<vmem>>, %arg5: memref<1x32xf32, #tpu.memory_space<vmem>>, %arg6: memref<32x128xf32, #tpu.memory_space<vmem>>, %arg7: memref<1x128xf32, #tpu.memory_space<vmem>>, %arg8: memref<128x128xf32, #tpu.memory_space<vmem>>, %arg9: memref<1x128xf32, #tpu.memory_space<vmem>>, %arg10: memref<104x128xf32, #tpu.memory_space<vmem>>) attributes {dimension_semantics = [#tpu.dimension_semantics<parallel>], iteration_bounds = array<i64: 2>, scalar_prefetch = 0 : i64, scratch_operands = 0 : i64, tpu.core_type = #tpu.core_type<tc>, window_params = [{transform_indices = @transform_0, window_bounds = array<i64: 104, 16>}, {pipeline_mode = #tpu.pipeline_mode<synchronous>, transform_indices = @transform_1, window_bounds = array<i64: 16, 32>}, {pipeline_mode = #tpu.pipeline_mode<synchronous>, transform_indices = @transform_2, window_bounds = array<i64: 1, 32>}, {pipeline_mode = #tpu.pipeline_mode<synchronous>, transform_indices = @transform_3, window_bounds = array<i64: 32, 32>}, {pipeline_mode = #tpu.pipeline_mode<synchronous>, transform_indices = @transform_4, window_bounds = array<i64: 1, 32>}, {pipeline_mode = #tpu.pipeline_mode<synchronous>, transform_indices = @transform_5, window_bounds = array<i64: 32, 128>}, {pipeline_mode = #tpu.pipeline_mode<synchronous>, transform_indices = @transform_6, window_bounds = array<i64: 1, 128>}, {pipeline_mode = #tpu.pipeline_mode<synchronous>, transform_indices = @transform_7, window_bounds = array<i64: 128, 128>}, {pipeline_mode = #tpu.pipeline_mode<synchronous>, transform_indices = @transform_8, window_bounds = array<i64: 1, 128>}, {transform_indices = @transform_9, window_bounds = array<i64: 104, 128>}]} {
    %c0 = arith.constant 0 : index
    %c0_0 = arith.constant 0 : index
    %0 = vector.load %arg1[%c0, %c0_0] : memref<104x16xf32, #tpu.memory_space<vmem>>, vector<104x16xf32>
    %c0_1 = arith.constant 0 : index
    %c0_2 = arith.constant 0 : index
    %1 = vector.load %arg2[%c0_1, %c0_2] : memref<16x32xf32, #tpu.memory_space<vmem>>, vector<16x32xf32>
    %cst = arith.constant dense<0.000000e+00> : vector<104x32xf32>
    %2 = tpu.matmul %0, %1, %cst {dimension_numbers = #tpu.dot_dimension_numbers<[1], [0], [0], [1], [0, 0, 1, 1], [], []>} : vector<104x16xf32>, vector<16x32xf32>, vector<104x32xf32> -> vector<104x32xf32>
    %c0_3 = arith.constant 0 : index
    %c0_4 = arith.constant 0 : index
    %3 = vector.load %arg3[%c0_3, %c0_4] : memref<1x32xf32, #tpu.memory_space<vmem>>, vector<1x32xf32>
    %4 = vector.broadcast %3 : vector<1x32xf32> to vector<104x32xf32>
    %5 = arith.addf %2, %4 : vector<104x32xf32>
    %cst_5 = arith.constant 0.000000e+00 : f32
    %6 = vector.broadcast %cst_5 : f32 to vector<104x32xf32>
    %7 = arith.maximumf %5, %6 : vector<104x32xf32>
    %c0_6 = arith.constant 0 : index
    %c0_7 = arith.constant 0 : index
    %8 = vector.load %arg4[%c0_6, %c0_7] : memref<32x32xf32, #tpu.memory_space<vmem>>, vector<32x32xf32>
    %cst_8 = arith.constant dense<0.000000e+00> : vector<104x32xf32>
    %9 = tpu.matmul %7, %8, %cst_8 {dimension_numbers = #tpu.dot_dimension_numbers<[1], [0], [0], [1], [0, 0, 1, 1], [], []>} : vector<104x32xf32>, vector<32x32xf32>, vector<104x32xf32> -> vector<104x32xf32>
    %c0_9 = arith.constant 0 : index
    %c0_10 = arith.constant 0 : index
    %10 = vector.load %arg5[%c0_9, %c0_10] : memref<1x32xf32, #tpu.memory_space<vmem>>, vector<1x32xf32>
    %11 = vector.broadcast %10 : vector<1x32xf32> to vector<104x32xf32>
    %12 = arith.addf %9, %11 : vector<104x32xf32>
    %cst_11 = arith.constant 0.000000e+00 : f32
    %13 = vector.broadcast %cst_11 : f32 to vector<104x32xf32>
    %14 = arith.maximumf %12, %13 : vector<104x32xf32>
    %c0_12 = arith.constant 0 : index
    %c0_13 = arith.constant 0 : index
    %15 = vector.load %arg6[%c0_12, %c0_13] : memref<32x128xf32, #tpu.memory_space<vmem>>, vector<32x128xf32>
    %cst_14 = arith.constant dense<0.000000e+00> : vector<104x128xf32>
    %16 = tpu.matmul %14, %15, %cst_14 {dimension_numbers = #tpu.dot_dimension_numbers<[1], [0], [0], [1], [0, 0, 1, 1], [], []>} : vector<104x32xf32>, vector<32x128xf32>, vector<104x128xf32> -> vector<104x128xf32>
    %c0_15 = arith.constant 0 : index
    %c0_16 = arith.constant 0 : index
    %17 = vector.load %arg7[%c0_15, %c0_16] : memref<1x128xf32, #tpu.memory_space<vmem>>, vector<1x128xf32>
    %18 = vector.broadcast %17 : vector<1x128xf32> to vector<104x128xf32>
    %19 = arith.addf %16, %18 : vector<104x128xf32>
    %c0_17 = arith.constant 0 : index
    %c0_18 = arith.constant 0 : index
    %20 = vector.load %arg9[%c0_17, %c0_18] : memref<1x128xf32, #tpu.memory_space<vmem>>, vector<1x128xf32>
    %cst_19 = arith.constant 5.000000e-01 : f32
    %21 = vector.broadcast %cst_19 : f32 to vector<1x128xf32>
    %22 = arith.cmpf ogt, %20, %21 : vector<1x128xf32>
    %cst_20 = arith.constant -1.000000e+30 : f32
    %23 = vector.shape_cast %22 : vector<1x128xi1> to vector<1x128xi1>
    %24 = vector.broadcast %23 : vector<1x128xi1> to vector<104x128xi1>
    %25 = vector.broadcast %cst_20 : f32 to vector<104x128xf32>
    %26 = arith.select %24, %19, %25 : vector<104x128xi1>, vector<104x128xf32>
    %cst_21 = arith.constant dense<0xFF800000> : vector<104xf32>
    %27 = vector.multi_reduction <maximumf>, %26, %cst_21 [1] : vector<104x128xf32> to vector<104xf32>
    %28 = vector.shape_cast %27 : vector<104xf32> to vector<104x1xf32>
    %29 = vector.broadcast %28 : vector<104x1xf32> to vector<104x128xf32>
    %30 = arith.subf %19, %29 : vector<104x128xf32>
    %31 = math.exp %30 : vector<104x128xf32>
    %cst_22 = arith.constant 0.000000e+00 : f32
    %32 = vector.shape_cast %22 : vector<1x128xi1> to vector<1x128xi1>
    %33 = vector.broadcast %32 : vector<1x128xi1> to vector<104x128xi1>
    %34 = vector.broadcast %cst_22 : f32 to vector<104x128xf32>
    %35 = arith.select %33, %31, %34 : vector<104x128xi1>, vector<104x128xf32>
    %c0_23 = arith.constant 0 : index
    %c0_24 = arith.constant 0 : index
    %36 = vector.load %arg8[%c0_23, %c0_24] : memref<128x128xf32, #tpu.memory_space<vmem>>, vector<128x128xf32>
    %cst_25 = arith.constant dense<0.000000e+00> : vector<104x128xf32>
    %37 = tpu.matmul %35, %36, %cst_25 {dimension_numbers = #tpu.dot_dimension_numbers<[1], [0], [0], [1], [0, 0, 1, 1], [], []>} : vector<104x128xf32>, vector<128x128xf32>, vector<104x128xf32> -> vector<104x128xf32>
    %cst_26 = arith.constant 1.000000e+00 : f32
    %38 = vector.broadcast %cst_26 : f32 to vector<1x128xf32>
    %39 = arith.subf %38, %20 : vector<1x128xf32>
    %40 = vector.broadcast %39 : vector<1x128xf32> to vector<104x128xf32>
    %41 = arith.addf %37, %40 : vector<104x128xf32>
    %42 = math.log %41 : vector<104x128xf32>
    %43 = vector.broadcast %28 : vector<104x1xf32> to vector<104x128xf32>
    %44 = arith.addf %43, %42 : vector<104x128xf32>
    %45 = vector.broadcast %20 : vector<1x128xf32> to vector<104x128xf32>
    %46 = arith.mulf %45, %44 : vector<104x128xf32>
    %47 = arith.subf %19, %46 : vector<104x128xf32>
    %c0_27 = arith.constant 0 : index
    %c0_28 = arith.constant 0 : index
    %48 = vector.load %arg10[%c0_27, %c0_28] : memref<104x128xf32, #tpu.memory_space<vmem>>, vector<104x128xf32>
    tpu.vector_store %arg10[%c0_27, %c0_28], %47 {strides = array<i32>} : memref<104x128xf32, #tpu.memory_space<vmem>>, vector<104x128xf32>,
    return
  }
  func.func @transform_0(%arg0: i32) -> (i32, i32) {
    %c0_i32 = arith.constant 0 : i32
    %c0_i32_0 = arith.constant 0 : i32
    return %arg0, %c0_i32 : i32, i32
  }
  func.func @transform_1(%arg0: i32) -> (i32, i32) {
    %c0_i32 = arith.constant 0 : i32
    %c0_i32_0 = arith.constant 0 : i32
    %c0_i32_1 = arith.constant 0 : i32
    return %c0_i32, %c0_i32_0 : i32, i32
  }
  func.func @transform_2(%arg0: i32) -> (i32, i32) {
    %c0_i32 = arith.constant 0 : i32
    %c0_i32_0 = arith.constant 0 : i32
    %c0_i32_1 = arith.constant 0 : i32
    return %c0_i32, %c0_i32_0 : i32, i32
  }
  func.func @transform_3(%arg0: i32) -> (i32, i32) {
    %c0_i32 = arith.constant 0 : i32
    %c0_i32_0 = arith.constant 0 : i32
    %c0_i32_1 = arith.constant 0 : i32
    return %c0_i32, %c0_i32_0 : i32, i32
  }
  func.func @transform_4(%arg0: i32) -> (i32, i32) {
    %c0_i32 = arith.constant 0 : i32
    %c0_i32_0 = arith.constant 0 : i32
    %c0_i32_1 = arith.constant 0 : i32
    return %c0_i32, %c0_i32_0 : i32, i32
  }
  func.func @transform_5(%arg0: i32) -> (i32, i32) {
    %c0_i32 = arith.constant 0 : i32
    %c0_i32_0 = arith.constant 0 : i32
    %c0_i32_1 = arith.constant 0 : i32
    return %c0_i32, %c0_i32_0 : i32, i32
  }
  func.func @transform_6(%arg0: i32) -> (i32, i32) {
    %c0_i32 = arith.constant 0 : i32
    %c0_i32_0 = arith.constant 0 : i32
    %c0_i32_1 = arith.constant 0 : i32
    return %c0_i32, %c0_i32_0 : i32, i32
  }
  func.func @transform_7(%arg0: i32) -> (i32, i32) {
    %c0_i32 = arith.constant 0 : i32
    %c0_i32_0 = arith.constant 0 : i32
    %c0_i32_1 = arith.constant 0 : i32
    return %c0_i32, %c0_i32_0 : i32, i32
  }
  func.func @transform_8(%arg0: i32) -> (i32, i32) {
    %c0_i32 = arith.constant 0 : i32
    %c0_i32_0 = arith.constant 0 : i32
    %c0_i32_1 = arith.constant 0 : i32
    return %c0_i32, %c0_i32_0 : i32, i32
  }
  func.func @transform_9(%arg0: i32) -> (i32, i32) {
    %c0_i32 = arith.constant 0 : i32
    %c0_i32_0 = arith.constant 0 : i32
    return %arg0, %c0_i32 : i32, i32
  }
}

</mosaic_0001>

<bundles_post_ra>
// kernel: decoder_forward.1
= control target key start
LH: loop header
LB: loop body
LE: loop exit
PB: predicated region body
PF: predicated region fallthrough
CT: control target
= control target key end

     0   :  { %s1781_s30 = smov 0   ;;  %s2352_s0 = inlined_call_operand.vmem [shape: f32[208,16], index: 0, kind: input, shape index: {}]   ;;  %s2353_s1 = inlined_call_operand.vmem [shape: f32[16,32], index: 1, kind: input, shape index: {}]   ;;  %s2354_s2 = inlined_call_operand.vmem [shape: f32[1,32], index: 2, kind: input, shape index: {}]   ;;  %s2355_s3 = inlined_call_operand.vmem [shape: f32[32,32], index: 3, kind: input, shape index: {}]   ;;  %s2356_s4 = inlined_call_operand.vmem [shape: f32[1,32], index: 4, kind: input, shape index: {}]   ;;  %s2357_s5 = inlined_call_operand.vmem [shape: f32[32,128], index: 5, kind: input, shape index: {}]   ;;  %s2358_s6 = inlined_call_operand.vmem [shape: f32[1,128], index: 6, kind: input, shape index: {}]   ;;  %s2359_s7 = inlined_call_operand.vmem [shape: f32[128,128], index: 7, kind: input, shape index: {}]   ;;  %s2360_s8 = inlined_call_operand.vmem [shape: f32[1,128], index: 8, kind: input, shape index: {}]   ;;  %s2361_s9 = inlined_call_operand.vmem [shape: f32[208,128], index: 9, kind: output, shape index: {}]  }
   0x1 LB: > { %s1307_s10 = sadd.s32 4294967295, %s1726_s30   ;;  %p1311_p0 = scmp.ge.s32.totalorder %s1726_s30, 1  ;;  %s1726_s30 = sphi %s1781_s30, %s19_s30  }
   0x2   : > { %p288_p1 = scmp.lt.s32.totalorder %s1726_s30, 3 }
   0x4   : > { %p289_p2 = pnand %p1311_p0, %p288_p1 }
   0x5   : > { %s324_s13 = smul.u32 (!%p289_p2), 13, %s1307_s10 }
   0x6   : > { %292 = sbr.rel (%p289_p2) target bundleno = 1029 (0x405), region = 56 }
   0x7   : > { %p325_p3 = scmp.lt.s32.totalorder (!%p289_p2), %s324_s13, 25 }
   0xb   : > { %v350_v0 = vld [vmem:[%s2353_s1 + $0x8] sm:$0xff]  ;;  %v1728_v1 = vmov 0.0   ;;  %v349_v2 = vld [vmem:[%s2353_s1] sm:$0xff]  ;;  %vm1729_vm0 = vmmov 0   ;;  %v544_v3 = vld [vmem:[%s2355_s3 + $0x18] sm:$0xff]  ;;  %s2365_s13 = smov (!%p325_p3, %s324_s13), 25 }
   0xc   : > { %1449 = vmatprep.subr.mxu0 %v1728_v1  ;;  %1453 = vmatprep.mubr.msk.f32.mxu0 %vm1729_vm0, %v1728_v1  ;;  %s1312_s18 = sshll.u32 %s2365_s13, 3  ;;  %vm358_vm1 = vcmask 130048   ;;  %v543_v17 = vld [vmem:[%s2355_s3 + $0x10] sm:$0xff]  ;;  %v542_v18 = vld [vmem:[%s2355_s3 + $0x8] sm:$0xff]  ;;  %v541_v19 = vld [vmem:[%s2355_s3] sm:$0xff]  ;;  %vm552_vm2 = vcmask 261120  }
   0xd   : > { %1450 = vmatpush3.msra.mxu0 %v350_v0  ;;  %1492 = vmatprep.subr.mxu1 %v1728_v1  ;;  %s1815_s21 = scalar_lea.vmem %s2352_s0, %s1312_s18  ;;  %v738_v20 = vld [vmem:[%s2357_s5 + $0x18] sm:$0xff]  ;;  %v737_v21 = vld [vmem:[%s2357_s5 + $0x10] sm:$0xff]  ;;  %v736_v22 = vld [vmem:[%s2357_s5 + $0x8] sm:$0xff]  ;;  %s2290_s24 = scalar_lea.vmem %s2361_s9, %s1312_s18 }
   0xe   : > { %1451 = vmatprep.subr.mxu0 %v1728_v1  ;;  %1493 = vmatpush3.msra.mxu1 %v544_v3  ;;  %v336_v4 = vld [vmem:[%s1815_s21] sm:$0xff]  ;;  %v337_v5 = vld [vmem:[%s1815_s21 + $0x8] sm:$0xff]  ;;  %v338_v6 = vld [vmem:[%s1815_s21 + $0x10] sm:$0xff] }
   0xf   : > { %1452 = vmatpush3.msra.mxu0 %v349_v2  ;;  %1494 = vmatprep.subr.mxu1 %v1728_v1  ;;  %v339_v7 = vld [vmem:[%s1815_s21 + $0x18] sm:$0xff]  ;;  %v340_v8 = vld [vmem:[%s1815_s21 + $0x20] sm:$0xff]  ;;  %v341_v9 = vld [vmem:[%s1815_s21 + $0x28] sm:$0xff] }
  0x10   : > { %1500 = vmatprep.mubr.msk.f32.mxu1 %vm1729_vm0, %v1728_v1  ;;  %1539 = vmatprep.subr.mxu0 %v1728_v1  ;;  %v342_v10 = vld [vmem:[%s1815_s21 + $0x30] sm:$0xff]  ;;  %v343_v11 = vld [vmem:[%s1815_s21 + $0x38] sm:$0xff]  ;;  %v344_v12 = vld [vmem:[%s1815_s21 + $0x40] sm:$0xff] }
  0x11   : > { %1454 = vmatmul.mubr.msk.f32.vlgmr.msra.gmra.mxu0 %vm358_vm1, %v336_v4  ;;  %v345_v13 = vld [vmem:[%s1815_s21 + $0x48] sm:$0xff]  ;;  %v346_v14 = vld [vmem:[%s1815_s21 + $0x50] sm:$0xff]  ;;  %v347_v15 = vld [vmem:[%s1815_s21 + $0x58] sm:$0xff]  ;;  %1495 = vmatpush3.msra.mxu1 %v543_v17 }
  0x12   : > { %1456 = vmatprep.mubr.msk.f32.mxu0 %vm1729_vm0, %v1728_v1  ;;  %v348_v16 = vld [vmem:[%s1815_s21 + $0x60] sm:$0xff]  ;;  %1496 = vmatprep.subr.mxu1 %v1728_v1 }
  0x13   : > { %1497 = vmatpush3.msra.mxu1 %v542_v18  ;;  %1540 = vmatpush3.msra.mxu0 %v738_v20  ;;  %v735_v23 = vld [vmem:[%s2357_s5] sm:$0xff] }
  0x14   : > { %1498 = vmatprep.subr.mxu1 %v1728_v1  ;;  %1541 = vmatprep.subr.mxu0 %v1728_v1  ;;  %v1899_v24 = vld [vmem:[%s2354_s2] ss:$0 sm:$0xff] }
  0x15   : > { %1457 = vmatmul.mubr.msk.f32.gmra.mxu0 %vm358_vm1, %v337_v5  ;;  %1499 = vmatpush3.msra.mxu1 %v541_v19 }
  0x16   : > { %1459 = vmatprep.mubr.msk.f32.mxu0 %vm1729_vm0, %v1728_v1  ;;  %1586 = vmatprep.subr.mxu1 %v1728_v1 }
  0x17   : > { %1542 = vmatpush3.msra.mxu0 %v737_v21 }
  0x18   : > { %1543 = vmatprep.subr.mxu0 %v1728_v1 }
  0x19   : > { %1460 = vmatmul.mubr.msk.f32.gmra.mxu0 %vm358_vm1, %v338_v6 }
  0x1a   : > { %1462 = vmatprep.mubr.msk.f32.mxu0 %vm1729_vm0, %v1728_v1  ;;  %1544 = vmatpush3.msra.mxu0 %v736_v22 }
  0x1b   : > { %1545 = vmatprep.subr.mxu0 %v1728_v1 }
  0x1c   : > { %1546 = vmatpush3.msra.mxu0 %v735_v23 }
  0x1d   : > { %1463 = vmatmul.mubr.msk.f32.gmra.mxu0 %vm358_vm1, %v339_v7 }
  0x1e   : > { %1465 = vmatprep.mubr.msk.f32.mxu0 %vm1729_vm0, %v1728_v1 }
  0x21   : > { %1466 = vmatmul.mubr.msk.f32.gmra.mxu0 %vm358_vm1, %v340_v8 }
  0x22   : > { %1468 = vmatprep.mubr.msk.f32.mxu0 %vm1729_vm0, %v1728_v1 }
  0x25   : > { %1469 = vmatmul.mubr.msk.f32.gmra.mxu0 %vm358_vm1, %v341_v9 }
  0x26   : > { %1471 = vmatprep.mubr.msk.f32.mxu0 %vm1729_vm0, %v1728_v1 }
  0x29   : > { %1472 = vmatmul.mubr.msk.f32.gmra.mxu0 %vm358_vm1, %v342_v10 }
  0x2a   : > { %1474 = vmatprep.mubr.msk.f32.mxu0 %vm1729_vm0, %v1728_v1 }
  0x2d   : > { %1475 = vmatmul.mubr.msk.f32.gmra.mxu0 %vm358_vm1, %v343_v11 }
  0x2e   : > { %1477 = vmatprep.mubr.msk.f32.mxu0 %vm1729_vm0, %v1728_v1 }
  0x31   : > { %1478 = vmatmul.mubr.msk.f32.gmra.mxu0 %vm358_vm1, %v344_v12 }
  0x32   : > { %1480 = vmatprep.mubr.msk.f32.mxu0 %vm1729_vm0, %v1728_v1 }
  0x35   : > { %1481 = vmatmul.mubr.msk.f32.gmra.mxu0 %vm358_vm1, %v345_v13 }
  0x36   : > { %1483 = vmatprep.mubr.msk.f32.mxu0 %vm1729_vm0, %v1728_v1 }
  0x39   : > { %1484 = vmatmul.mubr.msk.f32.gmra.mxu0 %vm358_vm1, %v346_v14  ;;  %v1956_v14 = vld [vmem:[%s2356_s4] ss:$0 sm:$0xff] }
  0x3a   : > { %1486 = vmatprep.mubr.msk.f32.mxu0 %vm1729_vm0, %v1728_v1 }
  0x3d   : > { %1487 = vmatmul.mubr.msk.f32.gmra.mxu0 %vm358_vm1, %v347_v15 }
  0x3e   : > { %1489 = vmatprep.mubr.msk.f32.mxu0 %vm1729_vm0, %v1728_v1 }
  0x41   : > { %1490 = vmatmul.mubr.msk.f32.gmra.mxu0 %vm358_vm1, %v348_v16 }
  0x42   : > { %1547 = vmatprep.mubr.msk.f32.mxu0 %vm1729_vm0, %v1728_v1 }
  0xd1   : > { %v464_v25 = vpop.f32.mrf.mxu0 }
  0xd2   : > { %v465_v26 = vadd.f32 %v1899_v24, %v464_v25 }
  0xd3   : > { %v1455_v27 = vpop.f32.mrf.mxu0 }
  0xd4   : > { %v528_v28 = vmax.f32 %v465_v26, 0.0 }
  0xd5   : > { %v469_v29 = vpop.f32.mrf.mxu0 }
  0xd6   : > { %v470_v30 = vadd.f32 %v1899_v24, %v469_v29  ;;  %1501 = vmatmul.mubr.msk.f32.vlgmr.msra.gmra.mxu1 %vm552_vm2, %v528_v28 }
  0xd7   : > { %v1458_v31 = vpop.f32.mrf.mxu0  ;;  %1503 = vmatprep.mubr.msk.f32.mxu1 %vm1729_vm0, %v1728_v1 }
  0xd8   : > { %v529_v32 = vmax.f32 %v470_v30, 0.0 }
  0xd9   : > { %v474_v33 = vpop.f32.mrf.mxu0 }
  0xda   : > { %v475_v34 = vadd.f32 %v1899_v24, %v474_v33  ;;  %1504 = vmatmul.mubr.msk.f32.gmra.mxu1 %vm552_vm2, %v529_v32 }
  0xdb   : > { %v1461_v35 = vpop.f32.mrf.mxu0  ;;  %1506 = vmatprep.mubr.msk.f32.mxu1 %vm1729_vm0, %v1728_v1 }
  0xdc   : > { %v530_v36 = vmax.f32 %v475_v34, 0.0 }
  0xdd   : > { %v479_v37 = vpop.f32.mrf.mxu0 }
  0xde   : > { %v480_v38 = vadd.f32 %v1899_v24, %v479_v37  ;;  %1507 = vmatmul.mubr.msk.f32.gmra.mxu1 %vm552_vm2, %v530_v36 }
  0xdf   : > { %v1464_v39 = vpop.f32.mrf.mxu0  ;;  %1509 = vmatprep.mubr.msk.f32.mxu1 %vm1729_vm0, %v1728_v1 }
  0xe0   : > { %v531_v40 = vmax.f32 %v480_v38, 0.0 }
  0xe1   : > { %v484_v41 = vpop.f32.mrf.mxu0 }
  0xe2   : > { %v485_v42 = vadd.f32 %v1899_v24, %v484_v41  ;;  %1510 = vmatmul.mubr.msk.f32.gmra.mxu1 %vm552_vm2, %v531_v40 }
  0xe3   : > { %v1467_v43 = vpop.f32.mrf.mxu0  ;;  %1512 = vmatprep.mubr.msk.f32.mxu1 %vm1729_vm0, %v1728_v1 }
  0xe4   : > { %v532_v44 = vmax.f32 %v485_v42, 0.0 }
  0xe5   : > { %v489_v45 = vpop.f32.mrf.mxu0 }
  0xe6   : > { %v490_v46 = vadd.f32 %v1899_v24, %v489_v45  ;;  %1513 = vmatmul.mubr.msk.f32.gmra.mxu1 %vm552_vm2, %v532_v44 }
  0xe7   : > { %v1470_v47 = vpop.f32.mrf.mxu0  ;;  %1515 = vmatprep.mubr.msk.f32.mxu1 %vm1729_vm0, %v1728_v1 }
  0xe8   : > { %v533_v48 = vmax.f32 %v490_v46, 0.0 }
  0xe9   : > { %v494_v49 = vpop.f32.mrf.mxu0 }
  0xea   : > { %v495_v50 = vadd.f32 %v1899_v24, %v494_v49  ;;  %1516 = vmatmul.mubr.msk.f32.gmra.mxu1 %vm552_vm2, %v533_v48 }
  0xeb   : > { %v1473_v51 = vpop.f32.mrf.mxu0  ;;  %1518 = vmatprep.mubr.msk.f32.mxu1 %vm1729_vm0, %v1728_v1 }
  0xec   : > { %v534_v52 = vmax.f32 %v495_v50, 0.0 }
  0xed   : > { %v499_v53 = vpop.f32.mrf.mxu0 }
  0xee   : > { %v500_v54 = vadd.f32 %v1899_v24, %v499_v53  ;;  %1519 = vmatmul.mubr.msk.f32.gmra.mxu1 %vm552_vm2, %v534_v52 }
  0xef   : > { %v1476_v55 = vpop.f32.mrf.mxu0  ;;  %1521 = vmatprep.mubr.msk.f32.mxu1 %vm1729_vm0, %v1728_v1 }
  0xf0   : > { %v535_v56 = vmax.f32 %v500_v54, 0.0 }
  0xf1   : > { %v504_v57 = vpop.f32.mrf.mxu0 }
  0xf2   : > { %v505_v58 = vadd.f32 %v1899_v24, %v504_v57  ;;  %1522 = vmatmul.mubr.msk.f32.gmra.mxu1 %vm552_vm2, %v535_v56 }
  0xf3   : > { %v1479_v59 = vpop.f32.mrf.mxu0  ;;  %1524 = vmatprep.mubr.msk.f32.mxu1 %vm1729_vm0, %v1728_v1 }
  0xf4   : > { %v536_v60 = vmax.f32 %v505_v58, 0.0 }
  0xf5   : > { %v509_v61 = vpop.f32.mrf.mxu0 }
  0xf6   : > { %v510_v62 = vadd.f32 %v1899_v24, %v509_v61  ;;  %1525 = vmatmul.mubr.msk.f32.gmra.mxu1 %vm552_vm2, %v536_v60 }
  0xf7   : > { %v1482_v63 = vpop.f32.mrf.mxu0  ;;  %1527 = vmatprep.mubr.msk.f32.mxu1 %vm1729_vm0, %v1728_v1 }
  0xf8   : > { %v537_v0 = vmax.f32 %v510_v62, 0.0 }
  0xf9   : > { %v514_v2 = vpop.f32.mrf.mxu0 }
  0xfa   : > { %v515_v3 = vadd.f32 %v1899_v24, %v514_v2  ;;  %1528 = vmatmul.mubr.msk.f32.gmra.mxu1 %vm552_vm2, %v537_v0 }
  0xfb   : > { %v1485_v4 = vpop.f32.mrf.mxu0  ;;  %1530 = vmatprep.mubr.msk.f32.mxu1 %vm1729_vm0, %v1728_v1 }
  0xfc   : > { %v538_v5 = vmax.f32 %v515_v3, 0.0  ;;  %v1029_v4 = vld [vmem:[%s2359_s7 + $0x78] sm:$0xff] }
  0xfd   : > { %v519_v6 = vpop.f32.mrf.mxu0  ;;  %1587 = vmatpush3.msra.mxu1 %v1029_v4 }
  0xfe   : > { %v520_v7 = vadd.f32 %v1899_v24, %v519_v6  ;;  %1531 = vmatmul.mubr.msk.f32.gmra.mxu1 %vm552_vm2, %v538_v5  ;;  %v1028_v5 = vld [vmem:[%s2359_s7 + $0x70] sm:$0xff]  ;;  %1588 = vmatprep.subr.mxu1 %v1728_v1  ;;  %v1027_v6 = vld [vmem:[%s2359_s7 + $0x68] sm:$0xff] }
  0xff   : > { %v1488_v8 = vpop.f32.mrf.mxu0  ;;  %1533 = vmatprep.mubr.msk.f32.mxu1 %vm1729_vm0, %v1728_v1  ;;  %1589 = vmatpush3.msra.mxu1 %v1028_v5 }
 0x100   : > { %v539_v9 = vmax.f32 %v520_v7, 0.0  ;;  %1590 = vmatprep.subr.mxu1 %v1728_v1  ;;  %v1026_v7 = vld [vmem:[%s2359_s7 + $0x60] sm:$0xff]  ;;  %v1025_v8 = vld [vmem:[%s2359_s7 + $0x58] sm:$0xff] }
 0x101   : > { %v524_v10 = vpop.f32.mrf.mxu0  ;;  %1591 = vmatpush3.msra.mxu1 %v1027_v6 }
 0x102   : > { %v525_v11 = vadd.f32 %v1899_v24, %v524_v10  ;;  %1534 = vmatmul.mubr.msk.f32.gmra.mxu1 %vm552_vm2, %v539_v9  ;;  %1592 = vmatprep.subr.mxu1 %v1728_v1  ;;  %v1024_v9 = vld [vmem:[%s2359_s7 + $0x50] sm:$0xff]  ;;  %v1023_v10 = vld [vmem:[%s2359_s7 + $0x48] sm:$0xff] }
 0x103   : > { %v1491_v12 = vpop.f32.mrf.mxu0  ;;  %1536 = vmatprep.mubr.msk.f32.mxu1 %vm1729_vm0, %v1728_v1  ;;  %1593 = vmatpush3.msra.mxu1 %v1026_v7 }
 0x104   : > { %v540_v13 = vmax.f32 %v525_v11, 0.0  ;;  %1594 = vmatprep.subr.mxu1 %v1728_v1  ;;  %v1022_v11 = vld [vmem:[%s2359_s7 + $0x40] sm:$0xff]  ;;  %v1021_v12 = vld [vmem:[%s2359_s7 + $0x38] sm:$0xff] }
 0x105   : > { %1595 = vmatpush3.msra.mxu1 %v1025_v8 }
 0x106   : > { %1537 = vmatmul.mubr.msk.f32.gmra.mxu1 %vm552_vm2, %v540_v13  ;;  %1596 = vmatprep.subr.mxu1 %v1728_v1  ;;  %v1020_v13 = vld [vmem:[%s2359_s7 + $0x30] sm:$0xff] }
 0x107   : > { %1618 = vmatprep.mubr.msk.f32.mxu1 %vm1729_vm0, %v1728_v1  ;;  %1597 = vmatpush3.msra.mxu1 %v1024_v9 }
 0x108   : > { %1598 = vmatprep.subr.mxu1 %v1728_v1 }
 0x109   : > { %1599 = vmatpush3.msra.mxu1 %v1023_v10 }
 0x10a   : > { %1600 = vmatprep.subr.mxu1 %v1728_v1 }
 0x10b   : > { %1601 = vmatpush3.msra.mxu1 %v1022_v11 }
 0x10c   : > { %1602 = vmatprep.subr.mxu1 %v1728_v1 }
 0x10d   : > { %1603 = vmatpush3.msra.mxu1 %v1021_v12 }
 0x10e   : > { %1604 = vmatprep.subr.mxu1 %v1728_v1 }
 0x10f   : > { %1605 = vmatpush3.msra.mxu1 %v1020_v13 }
 0x110   : > { %1606 = vmatprep.subr.mxu1 %v1728_v1 }
 0x196   : > { %v658_v15 = vpop.f32.mrf.mxu1 }
 0x197   : > { %v659_v16 = vadd.f32 %v1956_v14, %v658_v15  ;;  %v918_v15 = vlaneseq }
 0x198   : > { %v1502_v17 = vpop.f32.mrf.mxu1 }
 0x199   : > { %v722_v18 = vmax.f32 %v659_v16, 0.0  ;;  %v2055_v16 = vld [vmem:[%s2360_s8] sm:$0x1]  ;;  %v919_v17 = vshrl.u32 %v918_v15, 7 }
 0x19a   : > { %v663_v19 = vpop.f32.mrf.mxu1  ;;  %vm916_vm3 = vcmp.gt.f32.partialorder %v2055_v16, 0.5 }
 0x19b   : > { %v664_v20 = vadd.f32 %v1956_v14, %v663_v19  ;;  %1548 = vmatmul.mubr.msk.f32.vlgmr.msra.gmra.mxu0 %vm552_vm2, %v722_v18  ;;  %v2058_v18 = vsub.s32 0, %v919_v17  ;;  %v1730_v19 = vmov 0  }
 0x19c   : > { %v1505_v21 = vpop.f32.mrf.mxu1  ;;  %1550 = vmatprep.mubr.msk.f32.mxu0 %vm1729_vm0, %v1728_v1 }
 0x19d   : > { %v723_v22 = vmax.f32 %v664_v20, 0.0  ;;  %v917_v20 = vsel %vm916_vm3, 1, %v1730_v19 }
 0x19e   : > { %v668_v23 = vpop.f32.mrf.mxu1  ;;  %v921_v21 = vrot.slane %v917_v20, %v2058_v18 }
 0x19f   : > { %v669_v24 = vadd.f32 %v1956_v14, %v668_v23  ;;  %1551 = vmatmul.mubr.msk.f32.gmra.mxu0 %vm552_vm2, %v723_v22  ;;  %v2064_v22 = vld [vmem:[%s2358_s6] ss:$0 sm:$0xff] }
 0x1a0   : > { %v1508_v25 = vpop.f32.mrf.mxu1  ;;  %1553 = vmatprep.mubr.msk.f32.mxu0 %vm1729_vm0, %v1728_v1  ;;  %vm2066_vm4 = vcmp.eq.s32.totalorder %v921_v21, 1 }
 0x1a1   : > { %v724_v26 = vmax.f32 %v669_v24, 0.0 }
 0x1a2   : > { %v673_v27 = vpop.f32.mrf.mxu1 }
 0x1a3   : > { %v674_v28 = vadd.f32 %v1956_v14, %v673_v27  ;;  %1554 = vmatmul.mubr.msk.f32.gmra.mxu0 %vm552_vm2, %v724_v26 }
 0x1a4   : > { %v1511_v29 = vpop.f32.mrf.mxu1  ;;  %1556 = vmatprep.mubr.msk.f32.mxu0 %vm1729_vm0, %v1728_v1 }
 0x1a5   : > { %v725_v30 = vmax.f32 %v674_v28, 0.0 }
 0x1a6   : > { %v678_v31 = vpop.f32.mrf.mxu1 }
 0x1a7   : > { %v679_v32 = vadd.f32 %v1956_v14, %v678_v31  ;;  %1557 = vmatmul.mubr.msk.f32.gmra.mxu0 %vm552_vm2, %v725_v30 }
 0x1a8   : > { %v1514_v33 = vpop.f32.mrf.mxu1  ;;  %1559 = vmatprep.mubr.msk.f32.mxu0 %vm1729_vm0, %v1728_v1 }
 0x1a9   : > { %v726_v34 = vmax.f32 %v679_v32, 0.0 }
 0x1aa   : > { %v683_v35 = vpop.f32.mrf.mxu1 }
 0x1ab   : > { %v684_v36 = vadd.f32 %v1956_v14, %v683_v35  ;;  %1560 = vmatmul.mubr.msk.f32.gmra.mxu0 %vm552_vm2, %v726_v34 }
 0x1ac   : > { %v1517_v37 = vpop.f32.mrf.mxu1  ;;  %1562 = vmatprep.mubr.msk.f32.mxu0 %vm1729_vm0, %v1728_v1 }
 0x1ad   : > { %v727_v38 = vmax.f32 %v684_v36, 0.0 }
 0x1ae   : > { %v688_v39 = vpop.f32.mrf.mxu1 }
 0x1af   : > { %v689_v40 = vadd.f32 %v1956_v14, %v688_v39  ;;  %1563 = vmatmul.mubr.msk.f32.gmra.mxu0 %vm552_vm2, %v727_v38 }
 0x1b0   : > { %v1520_v41 = vpop.f32.mrf.mxu1  ;;  %1565 = vmatprep.mubr.msk.f32.mxu0 %vm1729_vm0, %v1728_v1 }
 0x1b1   : > { %v728_v42 = vmax.f32 %v689_v40, 0.0 }
 0x1b2   : > { %v693_v43 = vpop.f32.mrf.mxu1 }
 0x1b3   : > { %v694_v44 = vadd.f32 %v1956_v14, %v693_v43  ;;  %1566 = vmatmul.mubr.msk.f32.gmra.mxu0 %vm552_vm2, %v728_v42  ;;  %v1018_v43 = vld [vmem:[%s2359_s7 + $0x20] sm:$0xff] }
 0x1b4   : > { %v1523_v45 = vpop.f32.mrf.mxu1  ;;  %1568 = vmatprep.mubr.msk.f32.mxu0 %vm1729_vm0, %v1728_v1 }
 0x1b5   : > { %v729_v46 = vmax.f32 %v694_v44, 0.0 }
 0x1b6   : > { %v698_v47 = vpop.f32.mrf.mxu1 }
 0x1b7   : > { %v699_v48 = vadd.f32 %v1956_v14, %v698_v47  ;;  %1569 = vmatmul.mubr.msk.f32.gmra.mxu0 %vm552_vm2, %v729_v46 }
 0x1b8   : > { %v1526_v49 = vpop.f32.mrf.mxu1  ;;  %1571 = vmatprep.mubr.msk.f32.mxu0 %vm1729_vm0, %v1728_v1 }
 0x1b9   : > { %v730_v50 = vmax.f32 %v699_v48, 0.0  ;;  %v1017_v48 = vld [vmem:[%s2359_s7 + $0x18] sm:$0xff] }
 0x1ba   : > { %v703_v51 = vpop.f32.mrf.mxu1 }
 0x1bb   : > { %v704_v52 = vadd.f32 %v1956_v14, %v703_v51  ;;  %1572 = vmatmul.mubr.msk.f32.gmra.mxu0 %vm552_vm2, %v730_v50 }
 0x1bc   : > { %v1529_v53 = vpop.f32.mrf.mxu1  ;;  %1574 = vmatprep.mubr.msk.f32.mxu0 %vm1729_vm0, %v1728_v1 }
 0x1bd   : > { %v731_v54 = vmax.f32 %v704_v52, 0.0  ;;  %v1016_v53 = vld [vmem:[%s2359_s7 + $0x10] sm:$0xff] }
 0x1be   : > { %v708_v55 = vpop.f32.mrf.mxu1 }
 0x1bf   : > { %v709_v56 = vadd.f32 %v1956_v14, %v708_v55  ;;  %1575 = vmatmul.mubr.msk.f32.gmra.mxu0 %vm552_vm2, %v731_v54 }
 0x1c0   : > { %v1532_v57 = vpop.f32.mrf.mxu1  ;;  %1577 = vmatprep.mubr.msk.f32.mxu0 %vm1729_vm0, %v1728_v1 }
 0x1c1   : > { %v732_v58 = vmax.f32 %v709_v56, 0.0  ;;  %v1015_v56 = vld [vmem:[%s2359_s7 + $0x8] sm:$0xff] }
 0x1c2   : > { %v713_v59 = vpop.f32.mrf.mxu1 }
 0x1c3   : > { %v714_v60 = vadd.f32 %v1956_v14, %v713_v59  ;;  %1578 = vmatmul.mubr.msk.f32.gmra.mxu0 %vm552_vm2, %v732_v58  ;;  %v1014_v59 = vld [vmem:[%s2359_s7] sm:$0xff] }
 0x1c4   : > { %v1535_v61 = vpop.f32.mrf.mxu1  ;;  %1580 = vmatprep.mubr.msk.f32.mxu0 %vm1729_vm0, %v1728_v1 }
 0x1c5   : > { %v733_v62 = vmax.f32 %v714_v60, 0.0 }
 0x1c6   : > { %v718_v63 = vpop.f32.mrf.mxu1 }
 0x1c7   : > { %v719_v0 = vadd.f32 %v1956_v14, %v718_v63  ;;  %1581 = vmatmul.mubr.msk.f32.gmra.mxu0 %vm552_vm2, %v733_v62  ;;  %v1019_v14 = vld [vmem:[%s2359_s7 + $0x28] sm:$0xff] }
 0x1c8   : > { %v1538_v2 = vpop.f32.mrf.mxu1  ;;  %1583 = vmatprep.mubr.msk.f32.mxu0 %vm1729_vm0, %v1728_v1  ;;  %1607 = vmatpush3.msra.mxu1 %v1019_v14 }
 0x1c9   : > { %v734_v3 = vmax.f32 %v719_v0, 0.0  ;;  %1608 = vmatprep.subr.mxu1 %v1728_v1 }
 0x1ca   : > { %1609 = vmatpush3.msra.mxu1 %v1018_v43 }
 0x1cb   : > { %1584 = vmatmul.mubr.msk.f32.gmra.mxu0 %vm552_vm2, %v734_v3  ;;  %1610 = vmatprep.subr.mxu1 %v1728_v1 }
 0x1cc   : > { %1611 = vmatpush3.msra.mxu1 %v1017_v48 }
 0x1cd   : > { %1612 = vmatprep.subr.mxu1 %v1728_v1 }
 0x1ce   : > { %1613 = vmatpush3.msra.mxu1 %v1016_v53 }
 0x1cf   : > { %1614 = vmatprep.subr.mxu1 %v1728_v1 }
 0x1d0   : > { %1615 = vmatpush3.msra.mxu1 %v1015_v56 }
 0x1d1   : > { %1616 = vmatprep.subr.mxu1 %v1728_v1 }
 0x1d2   : > { %1617 = vmatpush3.msra.mxu1 %v1014_v59 }
 0x25b   : > { %v851_v23 = vpop.f32.mrf.mxu0 }
 0x25c   : > { %v2071_v25 = vadd.f32 %v2064_v22, %v851_v23 }
 0x25d   : > { %v1549_v26 = vpop.f32.mrf.mxu0 }
 0x25e   : > { %v923_v27 = vsel %vm2066_vm4, %v2071_v25, -1e+30 }
 0x25f   : > { %936 = vmax.xlane.f32.xlu0 %v923_v27  ;;  %v856_v28 = vpop.f32.mrf.mxu0 }
 0x260   : > { %v2077_v29 = vadd.f32 %v2064_v22, %v856_v28 }
 0x261   : > { %v1552_v30 = vpop.f32.mrf.mxu0 }
 0x262   : > { %v924_v31 = vsel %vm2066_vm4, %v2077_v29, -1e+30 }
 0x263   : > { %938 = vmax.xlane.f32.xlu0 %v924_v31  ;;  %v861_v32 = vpop.f32.mrf.mxu0 }
 0x264   : > { %v2083_v33 = vadd.f32 %v2064_v22, %v861_v32 }
 0x265   : > { %v1555_v34 = vpop.f32.mrf.mxu0 }
 0x266   : > { %v925_v35 = vsel %vm2066_vm4, %v2083_v33, -1e+30 }
 0x267   : > { %940 = vmax.xlane.f32.xlu1 %v925_v35  ;;  %v866_v36 = vpop.f32.mrf.mxu0 }
 0x268   : > { %v2089_v37 = vadd.f32 %v2064_v22, %v866_v36 }
 0x269   : > { %v1558_v38 = vpop.f32.mrf.mxu0 }
 0x26a   : > { %v926_v39 = vsel %vm2066_vm4, %v2089_v37, -1e+30 }
 0x26b   : > { %942 = vmax.xlane.f32.xlu1 %v926_v39  ;;  %v871_v40 = vpop.f32.mrf.mxu0 }
 0x26c   : > { %v2095_v41 = vadd.f32 %v2064_v22, %v871_v40 }
 0x26d   : > { %v1561_v42 = vpop.f32.mrf.mxu0 }
 0x26e   : > { %v927_v44 = vsel %vm2066_vm4, %v2095_v41, -1e+30 }
 0x26f   : > { %944 = vmax.xlane.f32.xlu0 %v927_v44  ;;  %v876_v45 = vpop.f32.mrf.mxu0 }
 0x270   : > { %v2105_v46 = vadd.f32 %v2064_v22, %v876_v45 }
 0x271   : > { %v1564_v47 = vpop.f32.mrf.mxu0 }
 0x272   : > { %v928_v49 = vsel %vm2066_vm4, %v2105_v46, -1e+30 }
 0x273   : > { %946 = vmax.xlane.f32.xlu1 %v928_v49  ;;  %v881_v50 = vpop.f32.mrf.mxu0 }
 0x274   : > { %v2115_v51 = vadd.f32 %v2064_v22, %v881_v50 }
 0x275   : > { %v1567_v52 = vpop.f32.mrf.mxu0 }
 0x276   : > { %v929_v54 = vsel %vm2066_vm4, %v2115_v51, -1e+30 }
 0x277   : > { %948 = vmax.xlane.f32.xlu0 %v929_v54  ;;  %v886_v55 = vpop.f32.mrf.mxu0 }
 0x278   : > { %v2128_v57 = vadd.f32 %v2064_v22, %v886_v55 }
 0x279   : > { %v1570_v58 = vpop.f32.mrf.mxu0 }
 0x27a   : > { %v930_v60 = vsel %vm2066_vm4, %v2128_v57, -1e+30 }
 0x27b   : > { %950 = vmax.xlane.f32.xlu1 %v930_v60  ;;  %v891_v61 = vpop.f32.mrf.mxu0 }
 0x27c   : > { %v2138_v62 = vadd.f32 %v2064_v22, %v891_v61 }
 0x27d   : > { %v1573_v63 = vpop.f32.mrf.mxu0 }
 0x27e   : > { %v931_v0 = vsel %vm2066_vm4, %v2138_v62, -1e+30 }
 0x27f   : > { %952 = vmax.xlane.f32.xlu0 %v931_v0  ;;  %v896_v2 = vpop.f32.mrf.mxu0 }
 0x280   : > { %v2144_v3 = vadd.f32 %v2064_v22, %v896_v2 }
 0x281   : > { %v1576_v4 = vpop.f32.mrf.mxu0 }
 0x282   : > { %v932_v5 = vsel %vm2066_vm4, %v2144_v3, -1e+30 }
 0x283   : > { %954 = vmax.xlane.f32.xlu1 %v932_v5  ;;  %v901_v6 = vpop.f32.mrf.mxu0 }
 0x284   : > { %v2150_v7 = vadd.f32 %v2064_v22, %v901_v6 }
 0x285   : > { %v1579_v8 = vpop.f32.mrf.mxu0 }
 0x286   : > { %v933_v9 = vsel %vm2066_vm4, %v2150_v7, -1e+30 }
 0x287   : > { %956 = vmax.xlane.f32.xlu0 %v933_v9  ;;  %v906_v10 = vpop.f32.mrf.mxu0 }
 0x288   : > { %v2156_v11 = vadd.f32 %v2064_v22, %v906_v10 }
 0x289   : > { %v1582_v12 = vpop.f32.mrf.mxu0 }
 0x28a   : > { %v934_v13 = vsel %vm2066_vm4, %v2156_v11, -1e+30 }
 0x28b   : > { %958 = vmax.xlane.f32.xlu1 %v934_v13  ;;  %v911_v14 = vpop.f32.mrf.mxu0 }
 0x28c   : > { %v2162_v15 = vadd.f32 %v2064_v22, %v911_v14 }
 0x28d   : > { %v1585_v17 = vpop.f32.mrf.mxu0 }
 0x28e   : > { %v935_v19 = vsel %vm2066_vm4, %v2162_v15, -1e+30 }
 0x28f   : > { %960 = vmax.xlane.f32.xlu0 %v935_v19 }
 0x2e8   : > { %v2167_v20 = vpop.xlane.xlu0 %936 }
 0x2e9   : > { %v962_v21 = vsub.f32 %v2071_v25, %v2167_v20 }
 0x2eb   : > { %v975_v23 = vmul.f32 1.442695, %v962_v21 }
 0x2ec   : > { %v2171_v26 = vpop.xlane.xlu0 %938 }
 0x2ed   : > { %1668 = vpow2.f32 %v975_v23  ;;  %v963_v27 = vsub.f32 %v2077_v29, %v2171_v26 }
 0x2ef   : > { %v977_v22 = vmul.f32 1.442695, %v963_v27 }
 0x2f0   : > { %v2175_v28 = vpop.xlane.xlu1 %940 }
 0x2f1   : > { %1670 = vpow2.f32 %v977_v22  ;;  %v964_v30 = vsub.f32 %v2083_v33, %v2175_v28 }
 0x2f3   : > { %v979_v31 = vmul.f32 1.442695, %v964_v30 }
 0x2f4   : > { %v2179_v32 = vpop.xlane.xlu1 %942 }
 0x2f5   : > { %1672 = vpow2.f32 %v979_v31  ;;  %v965_v34 = vsub.f32 %v2089_v37, %v2179_v32  ;;  %v1030_v31 = vsub.f32 1.0, %v2055_v16 }
 0x2f7   : > { %v981_v35 = vmul.f32 1.442695, %v965_v34  ;;  %v2271_v34 = vrot.slane %v1030_v31, %v2058_v18 }
 0x2f8   : > { %v2183_v36 = vpop.xlane.xlu0 %944 }
 0x2f9   : > { %1674 = vpow2.f32 %v981_v35  ;;  %v966_v38 = vsub.f32 %v2095_v41, %v2183_v36 }
 0x2fa   : > { %v1669_v39 = vpop.eup %1668 }
 0x2fb   : > { %v983_v40 = vmul.f32 1.442695, %v966_v38  ;;  %1619 = vmatmul.mubr.msk.f32.vlgmr.msra.gmra.mxu1 %vm2066_vm4, %v1669_v39 }
 0x2fc   : > { %v2189_v42 = vpop.xlane.xlu1 %946  ;;  %1621 = vmatprep.mubr.msk.f32.mxu1 %vm1729_vm0, %v1728_v1 }
 0x2fd   : > { %1676 = vpow2.f32 %v983_v40  ;;  %v967_v43 = vsub.f32 %v2105_v46, %v2189_v42 }
 0x2fe   : > { %v1671_v44 = vpop.eup %1670 }
 0x2ff   : > { %v985_v45 = vmul.f32 1.442695, %v967_v43  ;;  %1622 = vmatmul.mubr.msk.f32.gmra.mxu1 %vm2066_vm4, %v1671_v44 }
 0x300   : > { %v2197_v47 = vpop.xlane.xlu0 %948  ;;  %1624 = vmatprep.mubr.msk.f32.mxu1 %vm1729_vm0, %v1728_v1 }
 0x301   : > { %1678 = vpow2.f32 %v985_v45  ;;  %v968_v48 = vsub.f32 %v2115_v51, %v2197_v47 }
 0x302   : > { %v1673_v49 = vpop.eup %1672 }
 0x303   : > { %v987_v50 = vmul.f32 1.442695, %v968_v48  ;;  %1625 = vmatmul.mubr.msk.f32.gmra.mxu1 %vm2066_vm4, %v1673_v49 }
 0x304   : > { %v2205_v52 = vpop.xlane.xlu1 %950  ;;  %1627 = vmatprep.mubr.msk.f32.mxu1 %vm1729_vm0, %v1728_v1 }
 0x305   : > { %1680 = vpow2.f32 %v987_v50  ;;  %v969_v53 = vsub.f32 %v2128_v57, %v2205_v52 }
 0x306   : > { %v1675_v54 = vpop.eup %1674 }
 0x307   : > { %v989_v55 = vmul.f32 1.442695, %v969_v53  ;;  %1628 = vmatmul.mubr.msk.f32.gmra.mxu1 %vm2066_vm4, %v1675_v54 }
 0x308   : > { %v2213_v56 = vpop.xlane.xlu0 %952  ;;  %1630 = vmatprep.mubr.msk.f32.mxu1 %vm1729_vm0, %v1728_v1 }
 0x309   : > { %1682 = vpow2.f32 %v989_v55  ;;  %v970_v58 = vsub.f32 %v2138_v62, %v2213_v56 }
 0x30a   : > { %v1677_v59 = vpop.eup %1676 }
 0x30b   : > { %v991_v60 = vmul.f32 1.442695, %v970_v58  ;;  %1631 = vmatmul.mubr.msk.f32.gmra.mxu1 %vm2066_vm4, %v1677_v59  ;;  %v2279_v58 = vrot.slane %v2055_v16, %v2058_v18 }
 0x30c   : > { %v2221_v61 = vpop.xlane.xlu1 %954  ;;  %1633 = vmatprep.mubr.msk.f32.mxu1 %vm1729_vm0, %v1728_v1 }
 0x30d   : > { %1684 = vpow2.f32 %v991_v60  ;;  %v971_v63 = vsub.f32 %v2144_v3, %v2221_v61 }
 0x30e   : > { %v1679_v0 = vpop.eup %1678 }
 0x30f   : > { %v993_v2 = vmul.f32 1.442695, %v971_v63  ;;  %1634 = vmatmul.mubr.msk.f32.gmra.mxu1 %vm2066_vm4, %v1679_v0 }
 0x310   : > { %v2229_v4 = vpop.xlane.xlu0 %956  ;;  %1636 = vmatprep.mubr.msk.f32.mxu1 %vm1729_vm0, %v1728_v1 }
 0x311   : > { %1686 = vpow2.f32 %v993_v2  ;;  %v972_v5 = vsub.f32 %v2150_v7, %v2229_v4 }
 0x312   : > { %v1681_v6 = vpop.eup %1680 }
 0x313   : > { %v995_v8 = vmul.f32 1.442695, %v972_v5  ;;  %1637 = vmatmul.mubr.msk.f32.gmra.mxu1 %vm2066_vm4, %v1681_v6 }
 0x314   : > { %v2237_v9 = vpop.xlane.xlu1 %958  ;;  %1639 = vmatprep.mubr.msk.f32.mxu1 %vm1729_vm0, %v1728_v1 }
 0x315   : > { %1688 = vpow2.f32 %v995_v8  ;;  %v973_v10 = vsub.f32 %v2156_v11, %v2237_v9 }
 0x316   : > { %v1683_v12 = vpop.eup %1682 }
 0x317   : > { %v997_v13 = vmul.f32 1.442695, %v973_v10  ;;  %1640 = vmatmul.mubr.msk.f32.gmra.mxu1 %vm2066_vm4, %v1683_v12 }
 0x318   : > { %v2245_v14 = vpop.xlane.xlu0 %960  ;;  %1642 = vmatprep.mubr.msk.f32.mxu1 %vm1729_vm0, %v1728_v1 }
 0x319   : > { %1690 = vpow2.f32 %v997_v13  ;;  %v974_v17 = vsub.f32 %v2162_v15, %v2245_v14 }
 0x31a   : > { %v1685_v19 = vpop.eup %1684 }
 0x31b   : > { %v999_v21 = vmul.f32 1.442695, %v974_v17  ;;  %1643 = vmatmul.mubr.msk.f32.gmra.mxu1 %vm2066_vm4, %v1685_v19 }
 0x31c   : > { %1645 = vmatprep.mubr.msk.f32.mxu1 %vm1729_vm0, %v1728_v1 }
 0x31d   : > { %1692 = vpow2.f32 %v999_v21 }
 0x31e   : > { %v1687_v23 = vpop.eup %1686 }
 0x31f   : > { %1646 = vmatmul.mubr.msk.f32.gmra.mxu1 %vm2066_vm4, %v1687_v23 }
 0x320   : > { %1648 = vmatprep.mubr.msk.f32.mxu1 %vm1729_vm0, %v1728_v1 }
 0x322   : > { %v1689_v27 = vpop.eup %1688 }
 0x323   : > { %1649 = vmatmul.mubr.msk.f32.gmra.mxu1 %vm2066_vm4, %v1689_v27 }
 0x324   : > { %1651 = vmatprep.mubr.msk.f32.mxu1 %vm1729_vm0, %v1728_v1 }
 0x326   : > { %v1691_v22 = vpop.eup %1690 }
 0x327   : > { %1652 = vmatmul.mubr.msk.f32.gmra.mxu1 %vm2066_vm4, %v1691_v22 }
 0x328   : > { %1654 = vmatprep.mubr.msk.f32.mxu1 %vm1729_vm0, %v1728_v1 }
 0x32a   : > { %v1693_v30 = vpop.eup %1692 }
 0x32b   : > { %1655 = vmatmul.mubr.msk.f32.gmra.mxu1 %vm2066_vm4, %v1693_v30 }
 0x3bb   : > { %v1103_v35 = vpop.f32.mrf.mxu1 }
 0x3bc   : > { %v1104_v38 = vadd.f32 %v1103_v35, %v2271_v34 }
 0x3bd   : > { %v1620_v39 = vpop.f32.mrf.mxu1 }
 0x3be   : > { %1694 = vlog2.f32 %v1104_v38 }
 0x3bf   : > { %v1108_v40 = vpop.f32.mrf.mxu1 }
 0x3c0   : > { %v1109_v43 = vadd.f32 %v1108_v40, %v2271_v34 }
 0x3c1   : > { %v1623_v44 = vpop.f32.mrf.mxu1 }
 0x3c2   : > { %1696 = vlog2.f32 %v1109_v43 }
 0x3c3   : > { %v1113_v1 = vpop.f32.mrf.mxu1 }
 0x3c4   : > { %v1114_v45 = vadd.f32 %v1113_v1, %v2271_v34 }
 0x3c5   : > { %v1626_v24 = vpop.f32.mrf.mxu1 }
 0x3c6   : > { %1698 = vlog2.f32 %v1114_v45 }
 0x3c7   : > { %v1118_v48 = vpop.f32.mrf.mxu1 }
 0x3c8   : > { %v1119_v49 = vadd.f32 %v1118_v48, %v2271_v34 }
 0x3c9   : > { %v1629_v50 = vpop.f32.mrf.mxu1 }
 0x3ca   : > { %1700 = vlog2.f32 %v1119_v49 }
 0x3cb   : > { %v1695_v53 = vpop.eup %1694  ;;  %v1123_v54 = vpop.f32.mrf.mxu1 }
 0x3cc   : > { %v1168_v55 = vmul.f32 0.6931472, %v1695_v53  ;;  %v1124_v59 = vadd.f32 %v1123_v54, %v2271_v34 }
 0x3cd   : > { %v1632_v60 = vpop.f32.mrf.mxu1 }
 0x3ce   : > { %v1193_v63 = vadd.f32 %v1168_v55, %v2167_v20  ;;  %1702 = vlog2.f32 %v1124_v59 }
 0x3cf   : > { %v1697_v0 = vpop.eup %1696  ;;  %v1128_v2 = vpop.f32.mrf.mxu1 }
 0x3d0   : > { %v1212_v5 = vmul.f32 %v2279_v58, %v1193_v63  ;;  %v1170_v6 = vmul.f32 0.6931472, %v1697_v0  ;;  %v1129_v8 = vadd.f32 %v1128_v2, %v2271_v34 }
 0x3d1   : > { %v1635_v16 = vpop.f32.mrf.mxu1 }
 0x3d2   : > { %v1225_v18 = vsub.f32 %v2071_v25, %v1212_v5  ;;  %v1194_v20 = vadd.f32 %v1170_v6, %v2171_v26  ;;  %1704 = vlog2.f32 %v1129_v8 }
 0x3d3   : > { %v1699_v10 = vpop.eup %1698  ;;  %v1133_v12 = vpop.f32.mrf.mxu1 }
 0x3d4   : > { %1238 = vst [vmem:[%s2290_s24] sm:$0xff] %v1225_v18  ;;  %v1213_v13 = vmul.f32 %v2279_v58, %v1194_v20  ;;  %v1172_v17 = vmul.f32 0.6931472, %v1699_v10  ;;  %v1134_v19 = vadd.f32 %v1133_v12, %v2271_v34 }
 0x3d5   : > { %v1638_v21 = vpop.f32.mrf.mxu1 }
 0x3d6   : > { %v1226_v23 = vsub.f32 %v2077_v29, %v1213_v13  ;;  %v1195_v27 = vadd.f32 %v1172_v17, %v2175_v28  ;;  %1706 = vlog2.f32 %v1134_v19 }
 0x3d7   : > { %v1701_v22 = vpop.eup %1700  ;;  %v1138_v25 = vpop.f32.mrf.mxu1 }
 0x3d8   : > { %1239 = vst [vmem:[%s2290_s24 + $0x8] sm:$0xff] %v1226_v23  ;;  %v1214_v26 = vmul.f32 %v2279_v58, %v1195_v27  ;;  %v1174_v30 = vmul.f32 0.6931472, %v1701_v22  ;;  %v1139_v31 = vadd.f32 %v1138_v25, %v2271_v34 }
 0x3d9   : > { %v1641_v35 = vpop.f32.mrf.mxu1 }
 0x3da   : > { %v1227_v38 = vsub.f32 %v2083_v33, %v1214_v26  ;;  %v1196_v39 = vadd.f32 %v1174_v30, %v2179_v32  ;;  %1708 = vlog2.f32 %v1139_v31 }
 0x3db   : > { %v1703_v40 = vpop.eup %1702  ;;  %v1143_v29 = vpop.f32.mrf.mxu1 }
 0x3dc   : > { %1240 = vst [vmem:[%s2290_s24 + $0x10] sm:$0xff] %v1227_v38  ;;  %v1215_v28 = vmul.f32 %v2279_v58, %v1196_v39  ;;  %v1176_v43 = vmul.f32 0.6931472, %v1703_v40  ;;  %v1144_v44 = vadd.f32 %v1143_v29, %v2271_v34 }
 0x3dd   : > { %v1644_v1 = vpop.f32.mrf.mxu1 }
 0x3de   : > { %v1228_v45 = vsub.f32 %v2089_v37, %v1215_v28  ;;  %v1197_v24 = vadd.f32 %v1176_v43, %v2183_v36  ;;  %1710 = vlog2.f32 %v1144_v44 }
 0x3df   : > { %v1705_v48 = vpop.eup %1704  ;;  %v1148_v33 = vpop.f32.mrf.mxu1 }
 0x3e0   : > { %1241 = vst [vmem:[%s2290_s24 + $0x18] sm:$0xff] %v1228_v45  ;;  %v1216_v32 = vmul.f32 %v2279_v58, %v1197_v24  ;;  %v1178_v49 = vmul.f32 0.6931472, %v1705_v48  ;;  %v1149_v50 = vadd.f32 %v1148_v33, %v2271_v34 }
 0x3e1   : > { %v1647_v53 = vpop.f32.mrf.mxu1 }
 0x3e2   : > { %v1229_v54 = vsub.f32 %v2095_v41, %v1216_v32  ;;  %v1198_v55 = vadd.f32 %v1178_v49, %v2189_v42  ;;  %1712 = vlog2.f32 %v1149_v50 }
 0x3e3   : > { %v1707_v59 = vpop.eup %1706  ;;  %v1153_v37 = vpop.f32.mrf.mxu1 }
 0x3e4   : > { %1242 = vst [vmem:[%s2290_s24 + $0x20] sm:$0xff] %v1229_v54  ;;  %v1217_v36 = vmul.f32 %v2279_v58, %v1198_v55  ;;  %v1180_v60 = vmul.f32 0.6931472, %v1707_v59  ;;  %v1154_v63 = vadd.f32 %v1153_v37, %v2271_v34 }
 0x3e5   : > { %v1650_v0 = vpop.f32.mrf.mxu1 }
 0x3e6   : > { %v1230_v2 = vsub.f32 %v2105_v46, %v1217_v36  ;;  %v1199_v5 = vadd.f32 %v1180_v60, %v2197_v47  ;;  %1714 = vlog2.f32 %v1154_v63 }
 0x3e7   : > { %v1709_v6 = vpop.eup %1708  ;;  %v1158_v41 = vpop.f32.mrf.mxu1 }
 0x3e8   : > { %1243 = vst [vmem:[%s2290_s24 + $0x28] sm:$0xff] %v1230_v2  ;;  %v1218_v42 = vmul.f32 %v2279_v58, %v1199_v5  ;;  %v1182_v8 = vmul.f32 0.6931472, %v1709_v6  ;;  %v1159_v16 = vadd.f32 %v1158_v41, %v2271_v34 }
 0x3e9   : > { %v1653_v18 = vpop.f32.mrf.mxu1 }
 0x3ea   : > { %v1231_v20 = vsub.f32 %v2115_v51, %v1218_v42  ;;  %v1200_v10 = vadd.f32 %v1182_v8, %v2205_v52  ;;  %1716 = vlog2.f32 %v1159_v16 }
 0x3eb   : > { %v1711_v12 = vpop.eup %1710  ;;  %v1163_v46 = vpop.f32.mrf.mxu1 }
 0x3ec   : > { %1244 = vst [vmem:[%s2290_s24 + $0x30] sm:$0xff] %v1231_v20  ;;  %v1219_v47 = vmul.f32 %v2279_v58, %v1200_v10  ;;  %v1184_v13 = vmul.f32 0.6931472, %v1711_v12  ;;  %v1164_v17 = vadd.f32 %v1163_v46, %v2271_v34 }
 0x3ed   : > { %v1656_v19 = vpop.f32.mrf.mxu1 }
 0x3ee   : > { %v1232_v21 = vsub.f32 %v2128_v57, %v1219_v47  ;;  %v1201_v23 = vadd.f32 %v1184_v13, %v2213_v56  ;;  %1718 = vlog2.f32 %v1164_v17 }
 0x3ef   : > { %v1713_v51 = vpop.eup %1712 }
 0x3f0   : > { %1245 = vst [vmem:[%s2290_s24 + $0x38] sm:$0xff] %v1232_v21  ;;  %v1220_v52 = vmul.f32 %v2279_v58, %v1201_v23  ;;  %v1186_v27 = vmul.f32 0.6931472, %v1713_v51 }
 0x3f2   : > { %v1233_v22 = vsub.f32 %v2138_v62, %v1220_v52  ;;  %v1202_v25 = vadd.f32 %v1186_v27, %v2221_v61 }
 0x3f3   : > { %v1715_v26 = vpop.eup %1714 }
 0x3f4   : > { %1246 = vst [vmem:[%s2290_s24 + $0x40] sm:$0xff] %v1233_v22  ;;  %v1221_v34 = vmul.f32 %v2279_v58, %v1202_v25  ;;  %v1188_v57 = vmul.f32 0.6931472, %v1715_v26 }
 0x3f6   : > { %v1234_v30 = vsub.f32 %v2144_v3, %v1221_v34  ;;  %v1203_v56 = vadd.f32 %v1188_v57, %v2229_v4 }
 0x3f7   : > { %v1717_v31 = vpop.eup %1716 }
 0x3f8   : > { %1247 = vst [vmem:[%s2290_s24 + $0x48] sm:$0xff] %v1234_v30  ;;  %v1222_v35 = vmul.f32 %v2279_v58, %v1203_v56  ;;  %v1190_v38 = vmul.f32 0.6931472, %v1717_v31 }
 0x3fa   : > { %v1235_v62 = vsub.f32 %v2150_v7, %v1222_v35  ;;  %v1204_v61 = vadd.f32 %v1190_v38, %v2237_v9 }
 0x3fb   : > { %v1719_v39 = vpop.eup %1718 }
 0x3fc   : > { %1248 = vst [vmem:[%s2290_s24 + $0x50] sm:$0xff] %v1235_v62  ;;  %v1223_v40 = vmul.f32 %v2279_v58, %v1204_v61  ;;  %v1192_v29 = vmul.f32 0.6931472, %v1719_v39 }
 0x3fe   : > { %v1236_v28 = vsub.f32 %v2156_v11, %v1223_v40  ;;  %v1205_v3 = vadd.f32 %v1192_v29, %v2245_v14 }
 0x400   : > { %1249 = vst [vmem:[%s2290_s24 + $0x58] sm:$0xff] %v1236_v28  ;;  %v1224_v4 = vmul.f32 %v2279_v58, %v1205_v3 }
 0x402   : > { %v1237_v43 = vsub.f32 %v2162_v15, %v1224_v4 }
 0x404   : > { %1250 = vst [vmem:[%s2290_s24 + $0x60] sm:$0xff] %v1237_v43 }
 0x405 PF: > { %s19_s30 = sadd.s32 1, %s1726_s30  }
 0x406   : > { %p16_p4 = scmp.ge.s32.totalorder %s19_s30, 4  }
 0x408   :  { %18 = sbr.rel (!%p16_p4) target bundleno = 1 (0x1), region = 86 }

</bundles_post_ra>
